<compile_context>
chip_gen: v6e
topology: v6e:2x2x1
jax: 0.10.0
libtpu: 0.0.40
codegen_flags: <defaults>
</compile_context>

<pallas_src>
import functools

import jax
import jax.numpy as jnp
from jax import lax
from jax.experimental import pallas as pl
from jax.experimental.pallas import tpu as pltpu

_HIDDEN = 16
_LANE_PAD = 128  # compute-lane width for hidden activations / resident weights


def _round_up(a, m):
    return (a + m - 1) // m * m


def _mix32(x):
    """Murmur3-style avalanche on int32 (sign bit masked before shifts so the
    arithmetic right shift behaves like a logical one). Portable jnp ops only."""
    x = jnp.bitwise_xor(x, jnp.right_shift(jnp.bitwise_and(x, jnp.int32(0x7FFFFFFF)), 15))
    x = x * jnp.int32(-2048144789)          # 0x85EBCA6B (signed)
    x = jnp.bitwise_xor(x, jnp.right_shift(jnp.bitwise_and(x, jnp.int32(0x7FFFFFFF)), 13))
    x = x * jnp.int32(-1028477387)          # 0xC2B2AE35 (signed)
    x = jnp.bitwise_xor(x, jnp.right_shift(jnp.bitwise_and(x, jnp.int32(0x7FFFFFFF)), 16))
    return x


def _keep_mask(shape, row0, seed, salt, p):
    """Counter-based hash PRNG -> boolean keep mask with P(keep) = 1 - p.
    Keyed on the GLOBAL row index, so masks don't depend on block_b / grid."""
    rows = lax.broadcasted_iota(jnp.int32, shape, 0) + row0
    cols = lax.broadcasted_iota(jnp.int32, shape, 1)
    x = (rows * jnp.int32(1000003)) ^ (cols + jnp.int32(salt))
    x = _mix32(x + seed)
    bits = jnp.bitwise_and(x, jnp.int32(0x00FFFFFF))                 # 24 uniform bits
    thresh = jnp.int32(min(1 << 24, int(round((1.0 - p) * float(1 << 24)))))
    return bits < thresh


def _mlp3_kernel(seed_ref, x_ref, w1_ref, b1_ref, w2_ref, b2_ref, w3_ref, b3_ref,
                 o_ref, *, p, train, block_b):
    # seed_ref : SMEM (1,) int32 scalar-prefetch
    # x_ref    : (block_b, n_in)  f32 batch tile (unpadded, ragged last block OK)
    # w/b refs : zero-padded resident weights/biases (hidden padded to 128 lanes)
    # o_ref    : (block_b, n_classes) f32 output tile
    use_dropout = train and p > 0.0
    scale = jnp.float32(1.0 / (1.0 - p)) if p < 1.0 else jnp.float32(0.0)
    seed = seed_ref[0]
    row0 = pl.program_id(0) * block_b

    x = x_ref[...]
    h = jnp.dot(x, w1_ref[...], preferred_element_type=jnp.float32) + b1_ref[...]
    h = jnp.maximum(h, 0.0)
    if use_dropout:
        keep = _keep_mask(h.shape, row0, seed, 0x12345C7, p)
        h = jnp.where(keep, h * scale, 0.0)

    h = jnp.dot(h, w2_ref[...], preferred_element_type=jnp.float32) + b2_ref[...]
    h = jnp.maximum(h, 0.0)
    if use_dropout:
        keep = _keep_mask(h.shape, row0, seed, 0x7654321, p)
        h = jnp.where(keep, h * scale, 0.0)

    o = jnp.dot(h, w3_ref[...], preferred_element_type=jnp.float32) + b3_ref[...]
    o_ref[...] = o.astype(o_ref.dtype)


@functools.partial(jax.jit, static_argnames=("n_classes", "train", "p", "block_b"))
def mlp3_forward(x, params, *, n_classes, train=False, p=0.2, seed=0, block_b=None):
    """x: (B, n_input) f32.  params: dict from pack_params (hidden padded to 128)."""
    B, n_in = x.shape
    x = x.astype(jnp.float32)

    if block_b is None:
        # Large tiles amortize the ~0.35us per-grid-step overhead, but keep
        # >= 4 grid steps (2 per v7x TensorCore) when the batch allows.
        block_b = min(4096, _round_up(pl.cdiv(B, 4), 8))
    block_b = max(8, _round_up(block_b, 8))
    # v5e scoped-VMEM guard: keep double-buffered x + out tiles under ~8 MiB.
    row_bytes = 4 * (n_in + n_classes)
    vmem_rows = max(8, (((8 << 20) // (2 * row_bytes)) // 8) * 8)
    block_b = min(block_b, vmem_rows)

    grid = pl.cdiv(B, block_b)
    seed_arr = jnp.reshape(jnp.asarray(seed, jnp.int32), (1,))

    kernel = functools.partial(_mlp3_kernel, p=float(p), train=bool(train),
                               block_b=block_b)

    def x_map(i, seed_ref):
        return (i, 0)

    def const_map(i, seed_ref):
        return (0, 0)

    out = pl.pallas_call(
        kernel,
        out_shape=jax.ShapeDtypeStruct((B, n_classes), jnp.float32),
        grid_spec=pltpu.PrefetchScalarGridSpec(
            num_scalar_prefetch=1,                      # dropout seed in SMEM
            grid=(grid,),
            in_specs=[
                pl.BlockSpec((block_b, n_in), x_map),   # x batch tile (unpadded)
                pl.BlockSpec(params["w1"].shape, const_map),
                pl.BlockSpec(params["b1"].shape, const_map),
                pl.BlockSpec(params["w2"].shape, const_map),
                pl.BlockSpec(params["b2"].shape, const_map),
                pl.BlockSpec(params["w3"].shape, const_map),
                pl.BlockSpec(params["b3"].shape, const_map),
            ],
            out_specs=pl.BlockSpec((block_b, n_classes), x_map),
        ),
        compiler_params=pltpu.CompilerParams(
            dimension_semantics=("parallel",)),
    )(seed_arr, x, params["w1"], params["b1"], params["w2"], params["b2"],
      params["w3"], params["b3"])
    return out


def init_params(key, n_input, n_classes, hidden=_HIDDEN):
    """nn.Linear-style init: U(-1/sqrt(fan_in), 1/sqrt(fan_in)); W stored (in, out)."""
    def linear(k, fan_in, fan_out):
        kw, kb = jax.random.split(k)
        bound = 1.0 / jnp.sqrt(jnp.float32(fan_in))
        w = jax.random.uniform(kw, (fan_in, fan_out), jnp.float32, -bound, bound)
        b = jax.random.uniform(kb, (1, fan_out), jnp.float32, -bound, bound)
        return w, b

    k1, k2, k3 = jax.random.split(key, 3)
    w1, b1 = linear(k1, n_input, hidden)
    w2, b2 = linear(k2, hidden, hidden)
    w3, b3 = linear(k3, hidden, n_classes)
    return dict(w1=w1, b1=b1, w2=w2, b2=b2, w3=w3, b3=b3)


def pack_params(raw, lane_pad=_LANE_PAD):
    """Zero-pad the hidden width to `lane_pad` (128) so in-kernel activations fill
    full vreg lanes; HBM-facing x / output keep their natural narrow widths.
    Zero rows/cols are mathematically inert through ReLU and dropout."""
    n_in, h = raw["w1"].shape
    n_out = raw["w3"].shape[1]
    hp = _round_up(h, lane_pad)

    def pad(a, shape):
        a = jnp.asarray(a, jnp.float32)
        return jnp.zeros(shape, jnp.float32).at[: a.shape[0], : a.shape[1]].set(a)

    return dict(
        w1=pad(raw["w1"], (n_in, hp)),
        b1=pad(raw["b1"].reshape(1, -1), (1, hp)),
        w2=pad(raw["w2"], (hp, hp)),
        b2=pad(raw["b2"].reshape(1, -1), (1, hp)),
        w3=pad(raw["w3"], (hp, n_out)),
        b3=jnp.asarray(raw["b3"].reshape(1, -1), jnp.float32),
    )


def mlp3_ref(x, p):
    # Eval-mode reference (dropout = identity), matches torch forward in eval().
    h1 = jnp.maximum(x @ p["w1"] + p["b1"], 0.0)
    h2 = jnp.maximum(h1 @ p["w2"] + p["b2"], 0.0)
    return h2 @ p["w3"] + p["b3"]


if __name__ == "__main__":
    n_input, n_classes, p_drop = 32, 4, 0.2
    batch = 20  # deliberately NOT a tile multiple: exercises the ragged-block path

    key = jax.random.PRNGKey(0)
    kx, kp = jax.random.split(key)
    x = jax.random.normal(kx, (batch, n_input), jnp.float32)
    raw = init_params(kp, n_input, n_classes)
    packed = pack_params(raw)

    # Eval mode (dropout off) -> must match the pure-JAX reference.
    out = jax.block_until_ready(
        mlp3_forward(x, packed, n_classes=n_classes, p=p_drop, train=False))
    ref = mlp3_ref(x, raw)
    assert out.shape == (batch, n_classes)
    assert jnp.allclose(out, ref, atol=1e-5, rtol=1e-5), "mismatch vs reference"

    # Train mode: in-kernel dropout via portable counter-hash PRNG.
    # TODO(synk): dropout RNG stream intentionally differs from torch's RNG.
    out_tr = jax.block_until_ready(
        mlp3_forward(x, packed, n_classes=n_classes, p=p_drop, train=True, seed=123))
    assert out_tr.shape == (batch, n_classes)
    assert bool(jnp.all(jnp.isfinite(out_tr)))

    print("KERNEL_OK")
</pallas_src>

<mosaic_0001>
module attributes {stable_mosaic.version = 11 : i64} {
  func.func @_mlp3_kernel(%arg0: i32, %arg1: memref<1xi32, #tpu.memory_space<smem>>, %arg2: memref<8x32xf32, #tpu.memory_space<vmem>>, %arg3: memref<32x128xf32, #tpu.memory_space<vmem>>, %arg4: memref<1x128xf32, #tpu.memory_space<vmem>>, %arg5: memref<128x128xf32, #tpu.memory_space<vmem>>, %arg6: memref<1x128xf32, #tpu.memory_space<vmem>>, %arg7: memref<128x4xf32, #tpu.memory_space<vmem>>, %arg8: memref<1x4xf32, #tpu.memory_space<vmem>>, %arg9: memref<8x4xf32, #tpu.memory_space<vmem>>) attributes {dimension_semantics = [#tpu.dimension_semantics<parallel>], iteration_bounds = array<i64: 3>, scalar_prefetch = 1 : i64, scratch_operands = 0 : i64, tpu.core_type = #tpu.core_type<tc>, window_params = [{transform_indices = @transform_0, window_bounds = array<i64: 8, 32>}, {pipeline_mode = #tpu.pipeline_mode<synchronous>, transform_indices = @transform_1, window_bounds = array<i64: 32, 128>}, {pipeline_mode = #tpu.pipeline_mode<synchronous>, transform_indices = @transform_2, window_bounds = array<i64: 1, 128>}, {pipeline_mode = #tpu.pipeline_mode<synchronous>, transform_indices = @transform_3, window_bounds = array<i64: 128, 128>}, {pipeline_mode = #tpu.pipeline_mode<synchronous>, transform_indices = @transform_4, window_bounds = array<i64: 1, 128>}, {pipeline_mode = #tpu.pipeline_mode<synchronous>, transform_indices = @transform_5, window_bounds = array<i64: 128, 4>}, {pipeline_mode = #tpu.pipeline_mode<synchronous>, transform_indices = @transform_6, window_bounds = array<i64: 1, 4>}, {transform_indices = @transform_7, window_bounds = array<i64: 8, 4>}]} {
    %c0 = arith.constant 0 : index
    %c0_0 = arith.constant 0 : index
    %0 = vector.load %arg2[%c0, %c0_0] : memref<8x32xf32, #tpu.memory_space<vmem>>, vector<8x32xf32>
    %c0_1 = arith.constant 0 : index
    %c0_2 = arith.constant 0 : index
    %1 = vector.load %arg3[%c0_1, %c0_2] : memref<32x128xf32, #tpu.memory_space<vmem>>, vector<32x128xf32>
    %cst = arith.constant dense<0.000000e+00> : vector<8x128xf32>
    %2 = tpu.matmul %0, %1, %cst {dimension_numbers = #tpu.dot_dimension_numbers<[1], [0], [0], [1], [0, 0, 1, 1], [], []>} : vector<8x32xf32>, vector<32x128xf32>, vector<8x128xf32> -> vector<8x128xf32>
    %c0_3 = arith.constant 0 : index
    %c0_4 = arith.constant 0 : index
    %3 = vector.load %arg4[%c0_3, %c0_4] : memref<1x128xf32, #tpu.memory_space<vmem>>, vector<1x128xf32>
    %4 = vector.broadcast %3 : vector<1x128xf32> to vector<8x128xf32>
    %5 = arith.addf %2, %4 : vector<8x128xf32>
    %cst_5 = arith.constant 0.000000e+00 : f32
    %6 = vector.broadcast %cst_5 : f32 to vector<8x128xf32>
    %7 = arith.maximumf %5, %6 : vector<8x128xf32>
    %c0_6 = arith.constant 0 : index
    %c0_7 = arith.constant 0 : index
    %8 = vector.load %arg5[%c0_6, %c0_7] : memref<128x128xf32, #tpu.memory_space<vmem>>, vector<128x128xf32>
    %cst_8 = arith.constant dense<0.000000e+00> : vector<8x128xf32>
    %9 = tpu.matmul %7, %8, %cst_8 {dimension_numbers = #tpu.dot_dimension_numbers<[1], [0], [0], [1], [0, 0, 1, 1], [], []>} : vector<8x128xf32>, vector<128x128xf32>, vector<8x128xf32> -> vector<8x128xf32>
    %c0_9 = arith.constant 0 : index
    %c0_10 = arith.constant 0 : index
    %10 = vector.load %arg6[%c0_9, %c0_10] : memref<1x128xf32, #tpu.memory_space<vmem>>, vector<1x128xf32>
    %11 = vector.broadcast %10 : vector<1x128xf32> to vector<8x128xf32>
    %12 = arith.addf %9, %11 : vector<8x128xf32>
    %cst_11 = arith.constant 0.000000e+00 : f32
    %13 = vector.broadcast %cst_11 : f32 to vector<8x128xf32>
    %14 = arith.maximumf %12, %13 : vector<8x128xf32>
    %c0_12 = arith.constant 0 : index
    %c0_13 = arith.constant 0 : index
    %15 = vector.load %arg7[%c0_12, %c0_13] : memref<128x4xf32, #tpu.memory_space<vmem>>, vector<128x4xf32>
    %cst_14 = arith.constant dense<0.000000e+00> : vector<8x4xf32>
    %16 = tpu.matmul %14, %15, %cst_14 {dimension_numbers = #tpu.dot_dimension_numbers<[1], [0], [0], [1], [0, 0, 1, 1], [], []>} : vector<8x128xf32>, vector<128x4xf32>, vector<8x4xf32> -> vector<8x4xf32>
    %c0_15 = arith.constant 0 : index
    %c0_16 = arith.constant 0 : index
    %17 = vector.load %arg8[%c0_15, %c0_16] : memref<1x4xf32, #tpu.memory_space<vmem>>, vector<1x4xf32>
    %18 = vector.broadcast %17 : vector<1x4xf32> to vector<8x4xf32>
    %19 = arith.addf %16, %18 : vector<8x4xf32>
    %c0_17 = arith.constant 0 : index
    %c0_18 = arith.constant 0 : index
    %20 = vector.load %arg9[%c0_17, %c0_18] : memref<8x4xf32, #tpu.memory_space<vmem>>, vector<8x4xf32>
    tpu.vector_store %arg9[%c0_17, %c0_18], %19 {strides = array<i32>} : memref<8x4xf32, #tpu.memory_space<vmem>>, vector<8x4xf32>,
    return
  }
  func.func @transform_0(%arg0: i32, %arg1: memref<1xi32, #tpu.memory_space<smem>>) -> (i32, i32) {
    %c0_i32 = arith.constant 0 : i32
    %c0_i32_0 = arith.constant 0 : i32
    return %arg0, %c0_i32 : i32, i32
  }
  func.func @transform_1(%arg0: i32, %arg1: memref<1xi32, #tpu.memory_space<smem>>) -> (i32, i32) {
    %c0_i32 = arith.constant 0 : i32
    %c0_i32_0 = arith.constant 0 : i32
    %c0_i32_1 = arith.constant 0 : i32
    return %c0_i32, %c0_i32_0 : i32, i32
  }
  func.func @transform_2(%arg0: i32, %arg1: memref<1xi32, #tpu.memory_space<smem>>) -> (i32, i32) {
    %c0_i32 = arith.constant 0 : i32
    %c0_i32_0 = arith.constant 0 : i32
    %c0_i32_1 = arith.constant 0 : i32
    return %c0_i32, %c0_i32_0 : i32, i32
  }
  func.func @transform_3(%arg0: i32, %arg1: memref<1xi32, #tpu.memory_space<smem>>) -> (i32, i32) {
    %c0_i32 = arith.constant 0 : i32
    %c0_i32_0 = arith.constant 0 : i32
    %c0_i32_1 = arith.constant 0 : i32
    return %c0_i32, %c0_i32_0 : i32, i32
  }
  func.func @transform_4(%arg0: i32, %arg1: memref<1xi32, #tpu.memory_space<smem>>) -> (i32, i32) {
    %c0_i32 = arith.constant 0 : i32
    %c0_i32_0 = arith.constant 0 : i32
    %c0_i32_1 = arith.constant 0 : i32
    return %c0_i32, %c0_i32_0 : i32, i32
  }
  func.func @transform_5(%arg0: i32, %arg1: memref<1xi32, #tpu.memory_space<smem>>) -> (i32, i32) {
    %c0_i32 = arith.constant 0 : i32
    %c0_i32_0 = arith.constant 0 : i32
    %c0_i32_1 = arith.constant 0 : i32
    return %c0_i32, %c0_i32_0 : i32, i32
  }
  func.func @transform_6(%arg0: i32, %arg1: memref<1xi32, #tpu.memory_space<smem>>) -> (i32, i32) {
    %c0_i32 = arith.constant 0 : i32
    %c0_i32_0 = arith.constant 0 : i32
    %c0_i32_1 = arith.constant 0 : i32
    return %c0_i32, %c0_i32_0 : i32, i32
  }
  func.func @transform_7(%arg0: i32, %arg1: memref<1xi32, #tpu.memory_space<smem>>) -> (i32, i32) {
    %c0_i32 = arith.constant 0 : i32
    %c0_i32_0 = arith.constant 0 : i32
    return %arg0, %c0_i32 : i32, i32
  }
}

</mosaic_0001>

<bundles_post_ra>
// kernel: mlp3_forward.1
= control target key start
LH: loop header
LB: loop body
LE: loop exit
PB: predicated region body
PF: predicated region fallthrough
CT: control target
= control target key end

     0   :  { %14 = vsyncpa [#allocation5], 0  ;;  %s1261_s0 = inlined_call_operand.<no memory space> [shape: s32[1], index: 0, kind: input, shape index: {}]   ;;  %s1262_s1 = inlined_call_operand.hbm [shape: f32[20,32], index: 1, kind: input, shape index: {}]   ;;  %s1263_s2 = inlined_call_operand.hbm [shape: f32[32,128], index: 2, kind: input, shape index: {}]   ;;  %s1264_s3 = inlined_call_operand.vmem [shape: f32[1,128], index: 3, kind: input, shape index: {}]   ;;  %s1265_s4 = inlined_call_operand.vmem [shape: f32[128,128], index: 4, kind: input, shape index: {}]   ;;  %s1266_s5 = inlined_call_operand.vmem [shape: f32[1,128], index: 5, kind: input, shape index: {}]   ;;  %s1267_s6 = inlined_call_operand.vmem [shape: f32[128,4], index: 6, kind: input, shape index: {}]   ;;  %s1268_s7 = inlined_call_operand.vmem [shape: f32[1,4], index: 7, kind: input, shape index: {}]   ;;  %s1269_s8 = inlined_call_operand.vmem [shape: f32[20,4], index: 8, kind: output, shape index: {}]  }
   0x1   :  { %16 = vsyncpa [#allocation5 + $0x1], 0 }
   0x2   :  { %17 = vsyncpa [#allocation7], 0  ;;  %s997_s26 = smov 0   ;;  %s999_s27 = smov 0  }
   0x3   :  { %s1001_s28 = smov 0   ;;  %s1003_s29 = smov 0  }
   0x4 LB: > { %s1016_s30 = sadd.s32 4294967295, %s944_s29   ;;  %p43_p0 = scmp.ne.s32.totalorder %s936_s27, %s932_s26  ;;  %s944_s29 = sphi %s1003_s29, %s1284_s29   ;;  %s940_s28 = sphi %s1001_s28, %s1283_s28   ;;  %s936_s27 = sphi %s999_s27, %s1282_s27   ;;  %s932_s26 = sphi %s997_s26, %s1281_s26  }
   0x5   : > { %p1270_p1 = scmp.eq.s32.totalorder %s1016_s30, 0  ;;  %p663_p2 = scmp.ge.s32.totalorder %s944_s29, 1 }
   0x6   : > { %p206_p3 = scmp.lt.s32.totalorder %s944_s29, 4  ;;  %s946_s11 = smov [#allocation6]  }
   0x7   : > { %p1024_p4 = por %p1270_p1, %p43_p0  ;;  %s218_s12 = sshll.u32 %s946_s11, 4  ;;  %s219_s12 = int_to_ptr.vmem [resolvable:$true] %s218_s12 }
   0x8   : > { %p1028_p5 = pnand %p663_p2, %p206_p3  ;;  %s1041_s14 = sadd.s32 1, %s944_s29  }
   0x9   : > { %s1273_s9 = scalar_select %p1024_p4, 1, 0 }
   0xa   : > { %s1274_s10 = scalar_select %p1028_p5, 1, 0 }
   0xb   : > { %p804_p6 = pneg %p1028_p5  ;;  %s30_s15 = sadd.s32 1, %s940_s28 }
   0xc   : > { %s27_s16 = ssub.s32 %s944_s29, %s1041_s14  ;;  %s863_s17 = scalar_lea.vmem %s219_s12, 512 }
   0xd   : > { %p1036_p7 = pnand %p804_p6, %p1270_p1  ;;  %p864_p9 = scmp.ne.s32.totalorder %s219_s12, %s863_s17 }
   0xe   : > { %p871_p12 = scmp.lt.s32.totalorder %s219_s12, %s219_s12  ;;  %p872_p13 = scmp.lt.s32.totalorder %s863_s17, %s863_s17 }
   0xf   : > { %p854_p8 = pneg %p1036_p7 }
  0x10   : > { %p873_p0 = por %p872_p13, %p871_p12 }
  0x11   : > { %p866_p10 = pnand %p864_p9, %p854_p8 }
  0x13   : > { %p867_p11 = pneg %p866_p10 }
  0x15   : > { %p874_p2 = pnand %p873_p0, %p867_p11 }
  0x17   : > { %877 = shalt.err (!%p874_p2)
}
  0x18   : > { %s947_s18 = smov 128   ;;  %s948_s19 = smov 8  }
  0x19   : > { %807 = dma.hbm_to_vmem [thread:$0]  (!%p1036_p7), %s1263_s2, 512, %s219_s12, [#allocation7], %s947_s18, %s947_s18, %s948_s19  }
  0x1a   : > { %p28_p3 = scmp.eq.s32.totalorder %s27_s16, 0  ;;  %p37_p6 = scmp.ne.s32.totalorder %s940_s28, %s936_s27 }
  0x1b   : > { %p38_p8 = scmp.eq.s32.totalorder %s944_s29, 0  ;;  %p813_p9 = scmp.lt.s32.totalorder %s944_s29, 3 }
  0x1c   : > { %s1058_s22 = scalar_select %p28_p3, %s940_s28, %s30_s15  }
  0x1d   : > { %p39_p10 = por %p38_p8, %p37_p6  ;;  %s247_s23 = sand.u32 1, %s940_s28  }
  0x1e   : > { %s666_s0 = sshll.u32 %s247_s23, 3  ;;  %s667_s24 = sshll.u32 %s944_s29, 7 }
  0x1f   : > { %s1065_s11 = scalar_lea.hbm %s1262_s1, %s667_s24  ;;  %s251_s13 = scalar_lea.vmem [#allocation4], %s666_s0 }
  0x20   : > { %s258_s12 = sshll.u32 %s251_s13, 4  ;;  %p1067_p7 = pnand %p813_p9, %p39_p10  ;;  %s259_s12 = int_to_ptr.vmem [resolvable:$true] %s258_s12 }
  0x21   : > { %s248_s15 = scalar_lea.sflag [#allocation5], %s247_s23  ;;  %s878_s17 = scalar_lea.hbm %s1065_s11, 128 }
  0x22   : > { %p879_p11 = scmp.ne.s32.totalorder %s1065_s11, %s878_s17  ;;  %p880_p12 = pneg %p1067_p7 }
  0x23   : > { %s883_s19 = scalar_lea.hbm %s1262_s1, 384  ;;  %p884_p2 = scmp.lt.s32.totalorder %s1065_s11, %s1262_s1 }
  0x24   : > { %p881_p13 = pnand %p880_p12, %p879_p11  ;;  %p885_p3 = scmp.lt.s32.totalorder %s883_s19, %s878_s17 }
  0x26   : > { %p882_p0 = pneg %p881_p13  ;;  %p886_p6 = por %p885_p3, %p884_p2 }
  0x28   : > { %p887_p8 = pnand %p886_p6, %p882_p0 }
  0x2a   : > { %890 = shalt.err (!%p887_p8)
}
  0x2b   : > { %s891_s0 = scalar_lea.vmem %s259_s12, 128  ;;  %s949_s23 = smov [#allocation4]  }
  0x2c   : > { %p892_p9 = scmp.ne.s32.totalorder %s259_s12, %s891_s0  ;;  %s896_s24 = sshll.u32 %s949_s23, 4  ;;  %s897_s24 = int_to_ptr.vmem [resolvable:$false] %s896_s24 }
  0x2d   : > { %s898_s25 = scalar_lea.vmem %s897_s24, 256  ;;  %p899_p11 = scmp.lt.s32.totalorder %s259_s12, %s897_s24 }
  0x2e   : > { %p894_p10 = pnand %p892_p9, %p880_p12  ;;  %p900_p13 = scmp.lt.s32.totalorder %s898_s25, %s891_s0 }
  0x30   : > { %p895_p1 = pneg %p894_p10  ;;  %p901_p4 = por %p900_p13, %p899_p11 }
  0x32   : > { %p902_p5 = pnand %p901_p4, %p895_p1 }
  0x34   : > { %905 = shalt.err (!%p902_p5)
}
  0x35   : > { %811 = dma.hbm_to_vmem [thread:$0]  (!%p1067_p7), %s1065_s11, 128, %s259_s12, %s248_s15  }
  0x36   : > { %p1277_p0 = scmp.ne.s32.totalorder %s1274_s10, 0 }
  0x37   : > { %s269_s26 = sand.u32 (!%p1277_p0), 1, %s936_s27   ;;  %p1278_p12 = scmp.ne.s32.totalorder (!%p1277_p0), %s1273_s9, 0 }
  0x38   : > { %267 = sbr.rel (%p1277_p0) target bundleno = 665 (0x299), region = 48  ;;  %s669_s13 = sshll.u32 (!%p1277_p0), %s269_s26, 3 }
  0x39   : > { %s270_s17 = scalar_lea.sflag (!%p1277_p0), [#allocation5], %s269_s26  ;;  %s273_s29 = scalar_lea.vmem (!%p1277_p0), [#allocation4], %s669_s13 }
  0x3d   : > { %923 = dma.done.wait (%p1278_p12), %s270_s17, 128  }
  0x3e   : > { %925 = vsyncadd (%p1278_p12), %s270_s17, 4294967168  ;;  %p1279_p1 = scmp.eq.s32.totalorder %s1016_s30, 0 }
  0x40   : > { %927 = dma.done.wait (%p1279_p1), [#allocation7], 512   ;;  %p1280_p4 = pmov %p1279_p1 }
  0x41   : > { %v950_v0 = vmov 0.0   ;;  %vm951_vm0 = vmmov 0   ;;  %v315_v1 = vld [vmem:[#allocation6 + $0x18] sm:$0xff]  ;;  %v314_v2 = vld [vmem:[#allocation6 + $0x10] sm:$0xff]  ;;  %v413_v3 = vld [vmem:[%s1265_s4 + $0x78] sm:$0xff]  ;;  %vm323_vm1 = vcmask 261120  }
  0x42   : > { %929 = vsyncadd (%p1280_p4), [#allocation7], 4294966784  ;;  %717 = vmatprep.subr.mxu0 %v950_v0  ;;  %725 = vmatprep.mubr.msk.f32.mxu0 %vm951_vm0, %v950_v0  ;;  %v313_v4 = vld [vmem:[#allocation6 + $0x8] sm:$0xff]  ;;  %v412_v5 = vld [vmem:[%s1265_s4 + $0x70] sm:$0xff]  ;;  %p307_p5 = scmp.lt.s32.totalorder %s1016_s30, 2  ;;  %vm585_vm2 = vcmask 31744  }
  0x43   : > { %728 = vmatprep.subr.mxu1 %v950_v0  ;;  %760 = vmatprep.mubr.msk.f32.mxu1 %vm951_vm0, %v950_v0  ;;  %v411_v6 = vld [vmem:[%s1265_s4 + $0x68] sm:$0xff]  ;;  %v312_v7 = vld [vmem:[#allocation6] sm:$0xff]  ;;  %v410_v9 = vld [vmem:[%s1265_s4 + $0x60] sm:$0xff] }
  0x44   : > { %718 = vmatpush3.msra.mxu0 %v315_v1  ;;  %729 = vmatpush3.msra.mxu1 %v413_v3  ;;  %v311_v8 = vld [vmem:[%s273_s29] sm:$0xff]  ;;  %v409_v10 = vld [vmem:[%s1265_s4 + $0x58] sm:$0xff]  ;;  %v408_v11 = vld [vmem:[%s1265_s4 + $0x50] sm:$0xff]  ;;  %s1286_s30 = smov (!%p307_p5, %s1016_s30), 2 }
  0x45   : > { %719 = vmatprep.subr.mxu0 %v950_v0  ;;  %730 = vmatprep.subr.mxu1 %v950_v0  ;;  %v407_v12 = vld [vmem:[%s1265_s4 + $0x48] sm:$0xff]  ;;  %v406_v13 = vld [vmem:[%s1265_s4 + $0x40] sm:$0xff]  ;;  %v405_v14 = vld [vmem:[%s1265_s4 + $0x38] sm:$0xff]  ;;  %s671_s26 = sshll.u32 %s1286_s30, 3 }
  0x46   : > { %720 = vmatpush3.msra.mxu0 %v314_v2  ;;  %731 = vmatpush3.msra.mxu1 %v412_v5  ;;  %v404_v15 = vld [vmem:[%s1265_s4 + $0x30] sm:$0xff]  ;;  %v403_v16 = vld [vmem:[%s1265_s4 + $0x28] sm:$0xff]  ;;  %v402_v17 = vld [vmem:[%s1265_s4 + $0x20] sm:$0xff]  ;;  %s310_s10 = scalar_lea.vmem %s1269_s8, %s671_s26 }
  0x47   : > { %721 = vmatprep.subr.mxu0 %v950_v0  ;;  %732 = vmatprep.subr.mxu1 %v950_v0  ;;  %v401_v18 = vld [vmem:[%s1265_s4 + $0x18] sm:$0xff]  ;;  %v400_v19 = vld [vmem:[%s1265_s4 + $0x10] sm:$0xff]  ;;  %v399_v20 = vld [vmem:[%s1265_s4 + $0x8] sm:$0xff] }
  0x48   : > { %722 = vmatpush3.msra.mxu0 %v313_v4  ;;  %733 = vmatpush3.msra.mxu1 %v411_v6  ;;  %v398_v21 = vld [vmem:[%s1265_s4] sm:$0xff]  ;;  %v507_v22 = vld [vmem:[%s1267_s6 + $0x78] sm:$0xff]  ;;  %v506_v23 = vld [vmem:[%s1267_s6 + $0x70] sm:$0xff] }
  0x49   : > { %723 = vmatprep.subr.mxu0 %v950_v0  ;;  %734 = vmatprep.subr.mxu1 %v950_v0  ;;  %v505_v24 = vld [vmem:[%s1267_s6 + $0x68] sm:$0xff]  ;;  %v504_v25 = vld [vmem:[%s1267_s6 + $0x60] sm:$0xff]  ;;  %v503_v26 = vld [vmem:[%s1267_s6 + $0x58] sm:$0xff] }
  0x4a   : > { %724 = vmatpush3.msra.mxu0 %v312_v7  ;;  %735 = vmatpush3.msra.mxu1 %v410_v9  ;;  %v502_v27 = vld [vmem:[%s1267_s6 + $0x50] sm:$0xff]  ;;  %v501_v28 = vld [vmem:[%s1267_s6 + $0x48] sm:$0xff]  ;;  %v500_v29 = vld [vmem:[%s1267_s6 + $0x40] sm:$0xff] }
  0x4b   : > { %726 = vmatmul.mubr.msk.f32.vlgmr.msra.gmra.mxu0 %vm323_vm1, %v311_v8  ;;  %736 = vmatprep.subr.mxu1 %v950_v0  ;;  %v499_v30 = vld [vmem:[%s1267_s6 + $0x38] sm:$0xff]  ;;  %v498_v31 = vld [vmem:[%s1267_s6 + $0x30] sm:$0xff]  ;;  %v497_v32 = vld [vmem:[%s1267_s6 + $0x28] sm:$0xff] }
  0x4c   : > { %763 = vmatprep.subr.mxu0 %v950_v0  ;;  %737 = vmatpush3.msra.mxu1 %v409_v10  ;;  %v496_v33 = vld [vmem:[%s1267_s6 + $0x20] sm:$0xff]  ;;  %v495_v34 = vld [vmem:[%s1267_s6 + $0x18] sm:$0xff]  ;;  %v494_v40 = vld [vmem:[%s1267_s6 + $0x10] sm:$0xff] }
  0x4d   : > { %795 = vmatprep.mubr.msk.f32.mxu0 %vm951_vm0, %v950_v0  ;;  %738 = vmatprep.subr.mxu1 %v950_v0  ;;  %v672_v35 = vld [vmem:[%s1264_s3] ss:$0 sm:$0xff]  ;;  %v493_v41 = vld [vmem:[%s1267_s6 + $0x8] sm:$0xff] }
  0x4e   : > { %739 = vmatpush3.msra.mxu1 %v408_v11  ;;  %764 = vmatpush3.msra.mxu0 %v507_v22  ;;  %v492_v42 = vld [vmem:[%s1267_s6] sm:$0xff] }
  0x4f   : > { %740 = vmatprep.subr.mxu1 %v950_v0  ;;  %765 = vmatprep.subr.mxu0 %v950_v0  ;;  %v674_v43 = vld [vmem:[%s1266_s5] ss:$0 sm:$0xff] }
  0x50   : > { %741 = vmatpush3.msra.mxu1 %v407_v12  ;;  %766 = vmatpush3.msra.mxu0 %v506_v23  ;;  %v675_v48 = vld [vmem:[%s1268_s7] ss:$0 sm:$0xff] }
  0x51   : > { %742 = vmatprep.subr.mxu1 %v950_v0  ;;  %767 = vmatprep.subr.mxu0 %v950_v0 }
  0x52   : > { %743 = vmatpush3.msra.mxu1 %v406_v13  ;;  %768 = vmatpush3.msra.mxu0 %v505_v24 }
  0x53   : > { %744 = vmatprep.subr.mxu1 %v950_v0  ;;  %769 = vmatprep.subr.mxu0 %v950_v0 }
  0x54   : > { %745 = vmatpush3.msra.mxu1 %v405_v14  ;;  %770 = vmatpush3.msra.mxu0 %v504_v25 }
  0x55   : > { %746 = vmatprep.subr.mxu1 %v950_v0  ;;  %771 = vmatprep.subr.mxu0 %v950_v0 }
  0x56   : > { %747 = vmatpush3.msra.mxu1 %v404_v15  ;;  %772 = vmatpush3.msra.mxu0 %v503_v26 }
  0x57   : > { %748 = vmatprep.subr.mxu1 %v950_v0  ;;  %773 = vmatprep.subr.mxu0 %v950_v0 }
  0x58   : > { %749 = vmatpush3.msra.mxu1 %v403_v16  ;;  %774 = vmatpush3.msra.mxu0 %v502_v27 }
  0x59   : > { %750 = vmatprep.subr.mxu1 %v950_v0  ;;  %775 = vmatprep.subr.mxu0 %v950_v0 }
  0x5a   : > { %751 = vmatpush3.msra.mxu1 %v402_v17  ;;  %776 = vmatpush3.msra.mxu0 %v501_v28 }
  0x5b   : > { %752 = vmatprep.subr.mxu1 %v950_v0  ;;  %777 = vmatprep.subr.mxu0 %v950_v0 }
  0x5c   : > { %753 = vmatpush3.msra.mxu1 %v401_v18  ;;  %778 = vmatpush3.msra.mxu0 %v500_v29 }
  0x5d   : > { %754 = vmatprep.subr.mxu1 %v950_v0  ;;  %779 = vmatprep.subr.mxu0 %v950_v0 }
  0x5e   : > { %755 = vmatpush3.msra.mxu1 %v400_v19  ;;  %780 = vmatpush3.msra.mxu0 %v499_v30 }
  0x5f   : > { %756 = vmatprep.subr.mxu1 %v950_v0  ;;  %781 = vmatprep.subr.mxu0 %v950_v0 }
  0x60   : > { %757 = vmatpush3.msra.mxu1 %v399_v20  ;;  %782 = vmatpush3.msra.mxu0 %v498_v31 }
  0x61   : > { %758 = vmatprep.subr.mxu1 %v950_v0  ;;  %783 = vmatprep.subr.mxu0 %v950_v0 }
  0x62   : > { %759 = vmatpush3.msra.mxu1 %v398_v21  ;;  %784 = vmatpush3.msra.mxu0 %v497_v32 }
  0x63   : > { %785 = vmatprep.subr.mxu0 %v950_v0 }
  0x64   : > { %786 = vmatpush3.msra.mxu0 %v496_v33 }
  0x65   : > { %787 = vmatprep.subr.mxu0 %v950_v0 }
  0x66   : > { %788 = vmatpush3.msra.mxu0 %v495_v34 }
  0x67   : > { %789 = vmatprep.subr.mxu0 %v950_v0 }
  0x68   : > { %790 = vmatpush3.msra.mxu0 %v494_v40 }
  0x69   : > { %791 = vmatprep.subr.mxu0 %v950_v0 }
  0x6a   : > { %792 = vmatpush3.msra.mxu0 %v493_v41 }
  0x6b   : > { %793 = vmatprep.subr.mxu0 %v950_v0 }
  0x6c   : > { %794 = vmatpush3.msra.mxu0 %v492_v42 }
 0x10b   : > { %v393_v36 = vpop.f32.mrf.mxu0 }
 0x10c   : > { %v394_v37 = vadd.f32 %v672_v35, %v393_v36 }
 0x10d   : > { %v727_v38 = vpop.f32.mrf.mxu0 }
 0x10e   : > { %v397_v39 = vmax.f32 %v394_v37, 0.0 }
 0x110   : > { %761 = vmatmul.mubr.f32.vlgmr.msra.gmra.mxu1 %v397_v39 }
 0x1d0   : > { %v487_v44 = vpop.f32.mrf.mxu1 }
 0x1d1   : > { %v488_v45 = vadd.f32 %v674_v43, %v487_v44 }
 0x1d2   : > { %v762_v46 = vpop.f32.mrf.mxu1 }
 0x1d3   : > { %v491_v47 = vmax.f32 %v488_v45, 0.0 }
 0x1d5   : > { %796 = vmatmul.mubr.f32.vlgmr.msra.gmra.mxu0 %v491_v47 }
 0x295   : > { %v581_v49 = vpop.f32.mrf.mxu0 }
 0x296   : > { %v582_v50 = vadd.f32 %v675_v48, %v581_v49 }
 0x297   : > { %v797_v51 = vpop.f32.mrf.mxu0 }
 0x298   : > { %586 = vst.msk [vmem:[%s310_s10] sm:$0xff] %vm585_vm2, %v582_v50 }
 0x299 PF: > { %p20_p7 = scmp.ge.s32.totalorder %s1041_s14, 5   ;;  %s1281_s26 = smov %s936_s27 }
 0x29a   : > { %s1282_s27 = smov %s940_s28  ;;  %s1283_s28 = smov %s1058_s22 }
 0x29b   : > { %s1284_s29 = smov %s1041_s14  ;;  %22 = sbr.rel (!%p20_p7) target bundleno = 4 (0x4), region = 92 }
 0x2a0   :  { %606 = vsyncpa [#allocation5], 1 }
 0x2a1   :  { %608 = vsyncpa [#allocation5 + $0x1], 1 }
 0x2a2   :  { %609 = vsyncpa [#allocation7], 1 }

</bundles_post_ra>
